<compile_context>
chip_gen: v6e
topology: v6e:2x2x1
jax: 0.10.0
libtpu: 0.0.40
codegen_flags: <defaults>
</compile_context>

<pallas_src>
import functools

import jax
import jax.numpy as jnp
from jax.experimental import pallas as pl
from jax.experimental.pallas import tpu as pltpu


def _round_up(x, m):
    return (x + m - 1) // m * m


def _make_kernel_weights():
    # torch: tensor([[0,1,0],[1,-4,1],[0,1,0]]).expand(1, 3, 3, 3)  (frozen parameter)
    k2d = jnp.array([[0.0, 1.0, 0.0],
                     [1.0, -4.0, 1.0],
                     [0.0, 1.0, 0.0]], dtype=jnp.float32)
    return jnp.broadcast_to(k2d, (1, 3, 3, 3))


def _laplace_kernel(x_ref, o_ref, *, C, W):
    """One grid step = one group of `tb` images, flat per-image layout on lanes.

    x_ref: (tb, C*H*W) input dtype in VMEM
    o_ref: (tb, H*W)   output dtype in VMEM (f32 accumulation, cast at store)
    """
    L = o_ref.shape[1]                                   # H*W
    xx = x_ref[...].astype(jnp.float32)                  # (tb, C*L)
    CL = xx.shape[1]

    # Channel reduction via lane rolls: for p < L,
    #   roll(xx, CL - c*L)[p] == xx[p + c*L] == channel c at pixel p.
    t = xx
    for c in range(1, C):
        t = t + pltpu.roll(xx, shift=CL - c * L, axis=1)
    s = t[:, :L]                                         # channel sum, exact for p < L

    # 5-tap cross stencil: lap[p] = s[p-W] + s[p+W] + s[p-1] + s[p+1] - 4*s[p].
    # Wrap-around lands only in the first/last row (rolls by +-W) and first/last
    # column (rolls by +-1) of each image, all discarded by the 'valid' crop.
    lap = (pltpu.roll(s, shift=W, axis=1)                # s[p - W]
           + pltpu.roll(s, shift=L - W, axis=1)          # s[p + W]
           + pltpu.roll(s, shift=1, axis=1)              # s[p - 1]
           + pltpu.roll(s, shift=L - 1, axis=1)          # s[p + 1]
           - 4.0 * s)

    o_ref[...] = lap.astype(o_ref.dtype)


def _vmem_hard_cap():
    """Generation-aware VMEM ceiling (bytes), with headroom for Mosaic scratch."""
    try:
        cap = int(pltpu.get_tpu_info().vmem_capacity_bytes)
    except Exception:
        cap = 64 * 1024 * 1024          # conservative default: v7x physical VMEM
    return max(8 << 20, cap - (16 << 20))


def _pick_tb(N, per_img, budget, hard_cap):
    """Images per grid step; None => even a single image exceeds the VMEM cap."""
    fit_budget = int(budget // per_img)
    fit_hard = int(hard_cap // per_img)
    if fit_hard < 1:
        return None
    if fit_budget >= N:
        if N >= 16:
            # Keep G >= 2 so both v7x TensorCores get work on the "parallel" axis.
            return min(N, _round_up(-(-N // 2), 8))
        return N
    # Split the batch.  The (tb, lanes) blocks need tb % 8 == 0 or tb == N.
    tb = (min(fit_budget, fit_hard) // 8) * 8
    if tb >= 8:
        return tb
    if fit_hard >= 8 and N >= 8:
        return 8                        # over the soft budget, within the hard cap
    if N <= fit_hard:
        return N                        # whole (small) batch in one step
    return None


@jax.jit
def laplace_filter(x):
    """x: (N, 3, H, W) -> (N, 1, H-2, W-2): 'valid' conv with the fixed Laplacian."""
    N, C, H, W = x.shape
    assert C == 3, "LaplaceFilter expects exactly 3 input channels"
    assert H >= 3 and W >= 3
    L = H * W
    CL = C * L
    out_dtype = x.dtype if jnp.issubdtype(x.dtype, jnp.floating) else jnp.float32

    itemsize = jnp.dtype(x.dtype).itemsize
    out_itemsize = jnp.dtype(out_dtype).itemsize
    # Per-image VMEM (bytes): double-buffered in/out blocks plus the whole-tile f32
    # roll temporaries (xx, t over C*L; s, 4 taps, lap over L).
    per_img = (2 * CL * itemsize
               + 2 * L * out_itemsize
               + (2 * CL + 6 * L) * 4)

    hard_cap = _vmem_hard_cap()
    budget = max(4 << 20, min(hard_cap, 48 << 20) - (8 << 20))
    tb = _pick_tb(N, per_img, budget, hard_cap)

    if tb is None:
        # TODO(synk): halo'd row-strip Pallas tiling for single images whose working
        # set exceeds VMEM; fall back to the XLA conv for these extreme shapes.
        y = jax.lax.conv_general_dilated(
            x.astype(jnp.float32), _make_kernel_weights(), (1, 1), "VALID",
            dimension_numbers=("NCHW", "OIHW", "NCHW"))
        return y.astype(out_dtype)

    G = -(-N // tb)
    vmem_limit = int(min(hard_cap, max(32 << 20, tb * per_img + (8 << 20))))

    # Free reshape of the contiguous NCHW array; no transpose passes over HBM.
    x2 = x.reshape(N, CL)

    lap = pl.pallas_call(
        functools.partial(_laplace_kernel, C=C, W=W),
        out_shape=jax.ShapeDtypeStruct((N, L), out_dtype),
        grid_spec=pltpu.PrefetchScalarGridSpec(
            num_scalar_prefetch=0,
            grid=(G,),
            in_specs=[pl.BlockSpec((tb, CL), lambda g: (g, 0))],
            out_specs=pl.BlockSpec((tb, L), lambda g: (g, 0)),
        ),
        compiler_params=pltpu.CompilerParams(
            dimension_semantics=("parallel",),
            vmem_limit_bytes=vmem_limit,
        ),
    )(x2)

    # 'valid' crop: conv output (i, j) is the Laplacian centred at pixel (i+1, j+1).
    out = lap.reshape(N, H, W)[:, 1:H - 1, 1:W - 1]
    return out[:, None, :, :]


if __name__ == "__main__":
    key = jax.random.PRNGKey(0)
    # conv kernel requires exactly 3 input channels
    x = jax.random.normal(key, (2, 3, 16, 16), dtype=jnp.float32)

    out = jax.block_until_ready(laplace_filter(x))

    # reference check against XLA conv (same semantics as F.conv2d, 'valid')
    ref = jax.lax.conv_general_dilated(
        x, _make_kernel_weights(), window_strides=(1, 1), padding="VALID",
        dimension_numbers=("NCHW", "OIHW", "NCHW"))
    assert out.shape == (2, 1, 14, 14), out.shape
    err = float(jnp.max(jnp.abs(out - ref)))
    assert err < 1e-4, err

    print("KERNEL_OK")
</pallas_src>

<mosaic_0001>
module attributes {stable_mosaic.version = 11 : i64} {
  func.func @_laplace_kernel(%arg0: i32, %arg1: memref<2x768xf32, #tpu.memory_space<vmem>>, %arg2: memref<2x256xf32, #tpu.memory_space<vmem>>) attributes {dimension_semantics = [#tpu.dimension_semantics<parallel>], iteration_bounds = array<i64: 1>, scalar_prefetch = 0 : i64, scratch_operands = 0 : i64, tpu.core_type = #tpu.core_type<tc>, window_params = [{transform_indices = @transform_0, window_bounds = array<i64: 2, 768>}, {transform_indices = @transform_1, window_bounds = array<i64: 2, 256>}]} {
    %c0 = arith.constant 0 : index
    %c0_0 = arith.constant 0 : index
    %0 = vector.load %arg1[%c0, %c0_0] : memref<2x768xf32, #tpu.memory_space<vmem>>, vector<2x768xf32>
    %c512_i32 = arith.constant 512 : i32
    %1 = tpu.dynamic_rotate %0 by %c512_i32 dim 1 : vector<2x768xf32>, i32 -> vector<2x768xf32>
    %2 = arith.addf %0, %1 : vector<2x768xf32>
    %c256_i32 = arith.constant 256 : i32
    %3 = tpu.dynamic_rotate %0 by %c256_i32 dim 1 : vector<2x768xf32>, i32 -> vector<2x768xf32>
    %4 = arith.addf %2, %3 : vector<2x768xf32>
    %5 = vector.extract_strided_slice %4 {offsets = [0, 0], sizes = [2, 256], strides = [1, 1]} : vector<2x768xf32> to vector<2x256xf32>
    %c16_i32 = arith.constant 16 : i32
    %6 = tpu.dynamic_rotate %5 by %c16_i32 dim 1 : vector<2x256xf32>, i32 -> vector<2x256xf32>
    %c240_i32 = arith.constant 240 : i32
    %7 = tpu.dynamic_rotate %5 by %c240_i32 dim 1 : vector<2x256xf32>, i32 -> vector<2x256xf32>
    %8 = arith.addf %6, %7 : vector<2x256xf32>
    %c1_i32 = arith.constant 1 : i32
    %9 = tpu.dynamic_rotate %5 by %c1_i32 dim 1 : vector<2x256xf32>, i32 -> vector<2x256xf32>
    %10 = arith.addf %8, %9 : vector<2x256xf32>
    %c255_i32 = arith.constant 255 : i32
    %11 = tpu.dynamic_rotate %5 by %c255_i32 dim 1 : vector<2x256xf32>, i32 -> vector<2x256xf32>
    %12 = arith.addf %10, %11 : vector<2x256xf32>
    %cst = arith.constant 4.000000e+00 : f32
    %13 = vector.broadcast %cst : f32 to vector<2x256xf32>
    %14 = arith.mulf %13, %5 : vector<2x256xf32>
    %15 = arith.subf %12, %14 : vector<2x256xf32>
    %c0_1 = arith.constant 0 : index
    %c0_2 = arith.constant 0 : index
    %16 = vector.load %arg2[%c0_1, %c0_2] : memref<2x256xf32, #tpu.memory_space<vmem>>, vector<2x256xf32>
    tpu.vector_store %arg2[%c0_1, %c0_2], %15 {strides = array<i32>} : memref<2x256xf32, #tpu.memory_space<vmem>>, vector<2x256xf32>,
    return
  }
  func.func @transform_0(%arg0: i32) -> (i32, i32) {
    %c0_i32 = arith.constant 0 : i32
    %c0_i32_0 = arith.constant 0 : i32
    return %arg0, %c0_i32 : i32, i32
  }
  func.func @transform_1(%arg0: i32) -> (i32, i32) {
    %c0_i32 = arith.constant 0 : i32
    %c0_i32_0 = arith.constant 0 : i32
    return %arg0, %c0_i32 : i32, i32
  }
}

</mosaic_0001>

<bundles_post_ra>
// kernel: laplace_filter.1
= control target key start
LH: loop header
LB: loop body
LE: loop exit
PB: predicated region body
PF: predicated region fallthrough
CT: control target
= control target key end

     0   :  { %v16_v0 = vlaneseq  ;;  %v152_v3 = vmov 1983009808   ;;  %s154_s10 = smov 16   ;;  %s155_s11 = smov 1   ;;  %s176_s0 = inlined_call_operand.vmem [shape: f32[2,768], index: 0, kind: input, shape index: {}]   ;;  %s177_s1 = inlined_call_operand.vmem [shape: f32[2,256], index: 1, kind: output, shape index: {}]  }
   0x1   :  { %v8_v1 = vld [vmem:[%s176_s0] sm:$0xff]  ;;  %v144_v2 = vld.sshfl [vmem:[%s176_s0 + $0x8] sm:$0x33 pattern:$0x76325410]  ;;  %v14_v4 = vunpack.c.l.s4 %v152_v3  ;;  %s153_s0 = smov 112  }
   0x2   :  { %v17_v5 = vshrl.u32 %v16_v0, 7  ;;  %v12_v6 = vcombine.high %v8_v1, %v8_v1  ;;  %v35_v8 = vcombine.high %v144_v2, %v144_v2  ;;  %s156_s12 = smov 127   ;;  %v83_v30 = vand.u32 127, %v16_v0 }
   0x3   :  { %v15_v7 = vunpack.c.0.s8 %v14_v4 }
   0x4   :  { %v37_v12 = vcombine.low %v144_v2, %v35_v8  ;;  %vm91_vm0 = vcmp.lt.s32.totalorder %v83_v30, 112  ;;  %vm84_vm1 = vcmp.lt.s32.totalorder %v83_v30, 16  ;;  %vm100_vm2 = vcmp.lt.s32.totalorder %v83_v30, 1 }
   0x5   :  { %v18_v9 = vsub.s32 %v15_v7, %v17_v5  ;;  %vm109_vm3 = vcmp.lt.s32.totalorder %v83_v30, 127 }
   0x7   :  { %v19_v10 = vrot.slane %v8_v1, %v18_v9  ;;  %v26_v11 = vrot.slane %v12_v6, %v18_v9  ;;  %v51_v16 = vrot.slane %v37_v12, %v18_v9 }
   0x9   :  { %v27_v13 = vcombine.high %v26_v11, %v26_v11  ;;  %v55_v14 = vcombine.high %v19_v10, %v19_v10 }
   0xb   :  { %v36_v15 = vcombine.low %v26_v11, %v27_v13  ;;  %v56_v17 = vcombine.low %v19_v10, %v55_v14 }
   0xd   :  { %v44_v18 = vrot.slane %v36_v15, %v18_v9  ;;  %v63_v19 = vrot.slane %v56_v17, %v18_v9 }
   0xf   :  { %v52_v20 = vcombine.low %v44_v18, %v51_v16  ;;  %v64_v21 = vcombine.low %v51_v16, %v63_v19 }
  0x11   :  { %v54_v22 = vadd.f32 %v52_v20, %v8_v1 }
  0x13   :  { %v66_v23 = vadd.f32 %v64_v21, %v54_v22 }
  0x15   :  { %v74_v24 = vrot.slane %v66_v23, %v18_v9  ;;  %v114_v25 = vmul.f32 4.0, %v66_v23 }
  0x17   :  { %87 = vrot.lane.b32.xlu1 %v74_v24, %s153_s0  ;;  %78 = vrot.lane.b32.xlu0 %v74_v24, %s154_s10  ;;  %v75_v26 = vcombine.high %v74_v24, %v74_v24  ;;  %v122_v27 = vrot.slane %v114_v25, %v18_v9 }
  0x19   :  { %v123_v46 = vcombine.high %v122_v27, %v122_v27 }
  0x1b   :  { %96 = vrot.lane.b32.xlu0 %v74_v24, %s155_s11  ;;  %89 = vrot.lane.b32.xlu1 %v75_v26, %s153_s0 }
  0x1f   :  { %98 = vrot.lane.b32.xlu1 %v75_v26, %s155_s11  ;;  %80 = vrot.lane.b32.xlu0 %v75_v26, %s154_s10 }
  0x23   :  { %107 = vrot.lane.b32.xlu1 %v75_v26, %s156_s12  ;;  %105 = vrot.lane.b32.xlu0 %v74_v24, %s156_s12 }
  0x89   :  { %v88_v28 = vpop.permute.xlu1 %87  ;;  %v79_v29 = vpop.permute.xlu0 %78 }
  0x8d   :  { %v97_v31 = vpop.permute.xlu0 %96  ;;  %v90_v32 = vpop.permute.xlu1 %89 }
  0x8e   :  { %v92_v35 = vsel %vm91_vm0, %v88_v28, %v90_v32  ;;  %v93_v36 = vsel %vm91_vm0, %v90_v32, %v88_v28 }
  0x91   :  { %v99_v33 = vpop.permute.xlu1 %98  ;;  %v81_v34 = vpop.permute.xlu0 %80 }
  0x92   :  { %v85_v37 = vsel %vm84_vm1, %v79_v29, %v81_v34  ;;  %v86_v38 = vsel %vm84_vm1, %v81_v34, %v79_v29  ;;  %v101_v41 = vsel %vm100_vm2, %v97_v31, %v99_v33  ;;  %v102_v42 = vsel %vm100_vm2, %v99_v33, %v97_v31 }
  0x93   :  { %v94_v39 = vadd.f32 %v92_v35, %v86_v38  ;;  %v95_v40 = vadd.f32 %v93_v36, %v85_v37 }
  0x95   :  { %v108_v43 = vpop.permute.xlu1 %107  ;;  %v103_v44 = vadd.f32 %v102_v42, %v94_v39  ;;  %v104_v45 = vadd.f32 %v101_v41, %v95_v40  ;;  %v106_v47 = vpop.permute.xlu0 %105 }
  0x96   :  { %v110_v48 = vsel %vm109_vm3, %v106_v47, %v108_v43  ;;  %v111_v49 = vsel %vm109_vm3, %v108_v43, %v106_v47 }
  0x97   :  { %v112_v50 = vadd.f32 %v110_v48, %v103_v44  ;;  %v113_v51 = vadd.f32 %v111_v49, %v104_v45 }
  0x99   :  { %v126_v52 = vsub.f32 %v112_v50, %v122_v27  ;;  %v127_v53 = vsub.f32 %v113_v51, %v123_v46 }
  0x9b   :  { %v130_v54 = vcombine.low %v126_v52, %v127_v53 }
  0x9d   :  { %145 = vst.sshfl [vmem:[%s177_s1] sm:$0x33 pattern:$0x76325410] %v130_v54 }

</bundles_post_ra>
